<compile_context>
chip_gen: v6e
topology: v6e:2x2x1
jax: 0.10.0
libtpu: 0.0.40
codegen_flags: <defaults>
</compile_context>

<pallas_src>
import functools

import jax
import jax.numpy as jnp
from jax.experimental import pallas as pl
from jax.experimental.pallas import tpu as pltpu

V = 128   # vocab size (lane-aligned)
H = 32    # hidden size (no padding — full-array blocks satisfy (8,128) rule)


def _detect_bf16_eup():
    """bf16 transcendentals only where the EUP supports them (v6e / v7x)."""
    try:
        kind = jax.devices()[0].device_kind.lower()
    except Exception:
        return False
    return any(tag in kind for tag in ("v6", "v7", "7x"))


def _pick_tile(total_tokens):
    """Largest tile <= 1024 giving >= 2 grid steps (both TCs on v7x)."""
    for cand in (1024, 512, 256, 128, 64, 32, 16, 8):
        if -(-total_tokens // cand) >= 2:
            return cand
    return 8


# ----------------------------------------------------------------------------
# Pallas kernel: one-hot embed (+gated visual add) -> dense+tanh -> logits
#                -> masked cross-entropy per-tile partials
# ----------------------------------------------------------------------------
def _fused_lm_kernel(idlab_ref, vis_ref, emb_ref, w_ref, b_ref, head_ref,
                     part_ref, logits_ref=None, *, n_vis_tiles, bf16_eup):
    idlab = idlab_ref[...]                       # (TILE, 2) int32
    ids = idlab[:, 0:1]                          # (TILE, 1) token ids
    lab = idlab[:, 1:2]                          # (TILE, 1) labels (-100 = ignore)
    vocab = jax.lax.broadcasted_iota(jnp.int32, (1, V), 1)   # (1, V)

    # embedding lookup as one-hot @ emb (MXU is ~idle, this is free)
    onehot = (ids == vocab).astype(jnp.bfloat16)              # (TILE, V)
    x = jnp.dot(onehot, emb_ref[...], preferred_element_type=jnp.float32)

    # visual add only on tiles that belong to the img pass
    gate = (pl.program_id(0) < n_vis_tiles).astype(jnp.float32)
    x = x + vis_ref[...].astype(jnp.float32) * gate

    # tiny "transformer body": one dense layer + tanh
    h_pre = jnp.dot(x.astype(jnp.bfloat16), w_ref[...],
                    preferred_element_type=jnp.float32) + b_ref[...]
    if bf16_eup:
        h = jnp.tanh(h_pre.astype(jnp.bfloat16))              # bf16 EUP (v6e/v7x)
    else:
        h = jnp.tanh(h_pre).astype(jnp.bfloat16)               # f32 EUP (v5e)
    logits = jnp.dot(h, head_ref[...], preferred_element_type=jnp.float32)
    if logits_ref is not None:                                  # optional bf16 writeback
        logits_ref[...] = logits.astype(logits_ref.dtype)

    # masked token-level cross entropy (HF semantics: label == -100 ignored)
    valid = (lab >= 0).astype(jnp.float32)                      # (TILE, 1)
    m = jnp.max(logits, axis=-1, keepdims=True)
    if bf16_eup:
        e = jnp.exp((logits - m).astype(jnp.bfloat16)).astype(jnp.float32)
    else:
        e = jnp.exp(logits - m)
    lse = m + jnp.log(jnp.sum(e, axis=-1, keepdims=True))       # (TILE, 1)
    # one full-tile masked sum instead of per-row label gather (saves XLU work)
    # TODO(synk): labels >= V silently contribute 0 to label_sum (demo-safe).
    label_sum = jnp.sum(jnp.where((vocab == lab) & (lab >= 0), logits, 0.0))
    ls = jnp.sum(lse * valid) - label_sum
    cnt = jnp.sum(valid)

    # lane-dense per-tile partials: lane 0 = loss sum, lane 1 = valid count
    lane = jax.lax.broadcasted_iota(jnp.int32, (8, 128), 1)
    ls_b = jnp.broadcast_to(ls.reshape(1, 1), (8, 128))
    cnt_b = jnp.broadcast_to(cnt.reshape(1, 1), (8, 128))
    part_ref[...] = jnp.where(lane == 0, ls_b,
                              jnp.where(lane == 1, cnt_b,
                                        jnp.zeros((8, 128), jnp.float32)))


@functools.partial(jax.jit,
                   static_argnames=("tile", "n_vis_tiles", "emit_logits",
                                    "bf16_eup"))
def _fused_forward(idlab_all, vis, emb, w, b, head, *, tile, n_vis_tiles,
                   emit_logits, bf16_eup):
    t = idlab_all.shape[0]
    n_tiles = t // tile
    n_vis_blocks = vis.shape[0] // tile           # >= 1 (dummy block if no vis)

    in_specs = [
        pl.BlockSpec((tile, 2), lambda i: (i, 0)),                       # ids+labels
        pl.BlockSpec((tile, H), lambda i: (jnp.minimum(i, n_vis_blocks - 1), 0)),
        pl.BlockSpec((V, H), lambda i: (0, 0)),                          # emb (resident)
        pl.BlockSpec((H, H), lambda i: (0, 0)),                          # dense W
        pl.BlockSpec((1, H), lambda i: (0, 0)),                          # dense b
        pl.BlockSpec((H, V), lambda i: (0, 0)),                          # lm_head
    ]
    part_shape = jax.ShapeDtypeStruct((n_tiles * 8, 128), jnp.float32)
    part_spec = pl.BlockSpec((8, 128), lambda i: (i, 0))
    if emit_logits:
        out_shape = (part_shape, jax.ShapeDtypeStruct((t, V), jnp.bfloat16))
        out_specs = (part_spec, pl.BlockSpec((tile, V), lambda i: (i, 0)))
    else:
        out_shape = (part_shape,)
        out_specs = (part_spec,)

    param_bytes = (V * H + H * H + H * V) * 2 + H * 4
    cost = pl.CostEstimate(
        flops=2 * t * (V * H + H * H + H * V),
        transcendentals=t * (V + H),
        bytes_accessed=(t * 2 * 4 + vis.size * 2 + n_tiles * param_bytes
                        + n_tiles * 8 * 128 * 4
                        + (t * V * 2 if emit_logits else 0)))

    kernel = functools.partial(_fused_lm_kernel, n_vis_tiles=n_vis_tiles,
                               bf16_eup=bf16_eup)
    outs = pl.pallas_call(
        kernel,
        out_shape=out_shape,
        grid=(n_tiles,),
        in_specs=in_specs,
        out_specs=out_specs,
        cost_estimate=cost,
        compiler_params=pltpu.CompilerParams(
            dimension_semantics=("parallel",)),
    )(idlab_all, vis, emb, w, b, head)

    parts = outs[0].reshape(n_tiles, 8, 128)
    loss_sums = parts[:, 0, 0]        # (n_tiles,)
    counts = parts[:, 0, 1]           # (n_tiles,)
    logits = outs[1] if emit_logits else None
    return loss_sums, counts, logits


# ----------------------------------------------------------------------------
# Stand-in base causal LM parameters (hidden dim H = 32, no padding)
# ----------------------------------------------------------------------------
def init_params(key):
    k1, k2, k3 = jax.random.split(key, 3)
    emb = jax.random.normal(k1, (V, H), jnp.float32) * 0.02
    w = jax.random.normal(k2, (H, H), jnp.float32) * 0.1
    head = jax.random.normal(k3, (H, V), jnp.float32) * 0.1
    return dict(
        emb=emb.astype(jnp.bfloat16),
        w=w.astype(jnp.bfloat16),
        b=jnp.zeros((1, H), jnp.float32),
        head=head.astype(jnp.bfloat16),
    )


def _prep_pass(input_ids, attention_mask, labels, visual_embds, tile):
    """Causal shift + id/label packing + optional visual slab, padded to tile."""
    ids = input_ids.astype(jnp.int32)
    ids_shift = ids[:, :-1]                                   # predict t+1 from t
    if labels is not None:
        y_shift = labels[:, 1:].astype(jnp.int32)
        if attention_mask is not None:
            y_shift = jnp.where(attention_mask[:, 1:] == 1, y_shift, -100)
        has_lab = True
    else:
        y_shift = jnp.full(ids_shift.shape, -100, jnp.int32)
        has_lab = False

    b, sm1 = ids_shift.shape
    t = b * sm1
    t_pad = pl.cdiv(t, tile) * tile
    idlab = jnp.stack([ids_shift.reshape(t), y_shift.reshape(t)], axis=-1)
    # pad rows with -100: one-hot row is all-zero and the label is ignored
    idlab = jnp.pad(idlab, ((0, t_pad - t), (0, 0)), constant_values=-100)

    vis_flat = None
    if visual_embds is not None:
        vis = visual_embds.astype(jnp.float32)[:, :-1, :]      # match shifted inputs
        vis_flat = jnp.pad(vis.reshape(t, H),
                           ((0, t_pad - t), (0, 0))).astype(jnp.bfloat16)
    return idlab, vis_flat, (b, sm1, t), has_lab


# ----------------------------------------------------------------------------
# MultiCombine: both base-model passes fused into ONE pallas_call
# ----------------------------------------------------------------------------
class MultiCombine:
    def __init__(self, base_model_func, mix_weights=(1, 1), add_vis=True):
        self.params = base_model_func()
        self.mix_weights = mix_weights
        self.add_vis = add_vis
        self._bf16_eup = _detect_bf16_eup()

    def __call__(self, input_ids=None, attention_mask=None, labels=None,
                 pixel_values=None, inputs_embeds=None, valid_idxs=None,
                 visual_embds=None, vokens=None,
                 noimg_input_ids=None, noimg_attention_mask=None,
                 noimg_labels=None, noimg_vokens=None, return_logits=True):
        if self.add_vis not in (True, False):
            # TODO(synk): 'only_pixel' / 'vokens' branches need a vision tower /
            # voken head in the base model; not modeled here.
            raise NotImplementedError
        # TODO(synk): raw pixel_values / valid_idxs / inputs_embeds need the HF
        # base model's front-end; the add_vis=True path uses precomputed
        # visual_embds.
        vis = visual_embds if self.add_vis else None

        has_second = noimg_input_ids is not None
        t_raw = input_ids.shape[0] * (input_ids.shape[1] - 1)
        if has_second:
            t_raw += noimg_input_ids.shape[0] * (noimg_input_ids.shape[1] - 1)
        tile = _pick_tile(t_raw)

        idlab0, vis0, meta0, has_lab0 = _prep_pass(
            input_ids, attention_mask, labels, vis, tile)
        pieces = [idlab0]
        has_lab1 = False
        if has_second:
            idlab1, _, _, has_lab1 = _prep_pass(
                noimg_input_ids, noimg_attention_mask, noimg_labels, None, tile)
            pieces.append(idlab1)
        # only tiny (T,2) int32 ids/labels are concatenated (8 B/token); the
        # bulky activations never leave the kernel.
        idlab_all = jnp.concatenate(pieces, axis=0) if has_second else idlab0
        n_tiles0 = idlab0.shape[0] // tile

        if vis0 is None:
            vis_buf = jnp.zeros((tile, H), jnp.bfloat16)   # dummy, gated off
            n_vis_tiles = 0
        else:
            vis_buf = vis0
            n_vis_tiles = n_tiles0

        loss_sums, counts, logits_all = _fused_forward(
            idlab_all, vis_buf, self.params["emb"], self.params["w"],
            self.params["b"], self.params["head"],
            tile=tile, n_vis_tiles=n_vis_tiles,
            emit_logits=return_logits, bf16_eup=self._bf16_eup)

        now_loss = None
        if has_lab0:
            # NaN when every label is ignored — matches PyTorch CrossEntropyLoss
            loss_img = jnp.sum(loss_sums[:n_tiles0]) / jnp.sum(counts[:n_tiles0])
            now_loss = loss_img * self.mix_weights[0]
        if has_second and has_lab1:
            loss_noimg = (jnp.sum(loss_sums[n_tiles0:])
                          / jnp.sum(counts[n_tiles0:]))
            term = loss_noimg * self.mix_weights[1]
            now_loss = term if now_loss is None else now_loss + term

        logits = None
        if return_logits:
            b0, sm10, t0 = meta0
            logits = logits_all[:t0].reshape(b0, sm10, V)
        return {"loss": now_loss, "logits": logits}


if __name__ == "__main__":
    B, S = 2, 8
    key = jax.random.PRNGKey(0)
    kid, kvis, knid = jax.random.split(key, 3)

    input_ids = jax.random.randint(kid, (B, S), 0, V, dtype=jnp.int32)
    attention_mask = jnp.ones((B, S), jnp.int32).at[1, S - 2:].set(0)
    labels = input_ids
    visual_embds = jax.random.normal(kvis, (B, S, H), jnp.float32) * 0.05

    noimg_input_ids = jax.random.randint(knid, (B, S), 0, V, dtype=jnp.int32)
    noimg_attention_mask = jnp.ones((B, S), jnp.int32)
    noimg_labels = noimg_input_ids

    model = MultiCombine(lambda: init_params(jax.random.PRNGKey(42)),
                         mix_weights=(1, 1), add_vis=True)

    # full path (loss + logits, as the PyTorch module returns)
    out = model(input_ids=input_ids, attention_mask=attention_mask,
                labels=labels, visual_embds=visual_embds,
                noimg_input_ids=noimg_input_ids,
                noimg_attention_mask=noimg_attention_mask,
                noimg_labels=noimg_labels)
    jax.block_until_ready(out["loss"])
    jax.block_until_ready(out["logits"])
    assert out["loss"].shape == ()
    assert bool(jnp.isfinite(out["loss"]))
    assert out["logits"].shape == (B, S - 1, V)

    # lean training path (loss only, no logits writeback) — same loss value
    out_loss_only = model(input_ids=input_ids, attention_mask=attention_mask,
                          labels=labels, visual_embds=visual_embds,
                          noimg_input_ids=noimg_input_ids,
                          noimg_attention_mask=noimg_attention_mask,
                          noimg_labels=noimg_labels, return_logits=False)
    jax.block_until_ready(out_loss_only["loss"])
    assert bool(jnp.allclose(out["loss"], out_loss_only["loss"],
                             rtol=1e-5, atol=1e-5))

    # img-pass-only (no second pass) still works
    out_single = model(input_ids=input_ids, attention_mask=attention_mask,
                       labels=labels, visual_embds=visual_embds,
                       return_logits=False)
    jax.block_until_ready(out_single["loss"])
    assert bool(jnp.isfinite(out_single["loss"]))

    print("KERNEL_OK")
</pallas_src>

<mosaic_0001>
module attributes {stable_mosaic.version = 11 : i64} {
  func.func @_fused_lm_kernel(%arg0: i32, %arg1: memref<16x2xi32, #tpu.memory_space<vmem>>, %arg2: memref<16x32xbf16, #tpu.memory_space<vmem>>, %arg3: memref<128x32xbf16, #tpu.memory_space<vmem>>, %arg4: memref<32x32xbf16, #tpu.memory_space<vmem>>, %arg5: memref<1x32xf32, #tpu.memory_space<vmem>>, %arg6: memref<32x128xbf16, #tpu.memory_space<vmem>>, %arg7: memref<8x128xf32, #tpu.memory_space<vmem>>, %arg8: memref<16x128xbf16, #tpu.memory_space<vmem>>) attributes {dimension_semantics = [#tpu.dimension_semantics<parallel>], iteration_bounds = array<i64: 2>, scalar_prefetch = 0 : i64, scratch_operands = 0 : i64, tpu.core_type = #tpu.core_type<tc>, window_params = [{transform_indices = @transform_0, window_bounds = array<i64: 16, 2>}, {transform_indices = @transform_1, window_bounds = array<i64: 16, 32>}, {pipeline_mode = #tpu.pipeline_mode<synchronous>, transform_indices = @transform_2, window_bounds = array<i64: 128, 32>}, {pipeline_mode = #tpu.pipeline_mode<synchronous>, transform_indices = @transform_3, window_bounds = array<i64: 32, 32>}, {pipeline_mode = #tpu.pipeline_mode<synchronous>, transform_indices = @transform_4, window_bounds = array<i64: 1, 32>}, {pipeline_mode = #tpu.pipeline_mode<synchronous>, transform_indices = @transform_5, window_bounds = array<i64: 32, 128>}, {transform_indices = @transform_6, window_bounds = array<i64: 8, 128>}, {transform_indices = @transform_7, window_bounds = array<i64: 16, 128>}]} {
    %c0 = arith.constant 0 : index
    %c0_0 = arith.constant 0 : index
    %0 = vector.load %arg1[%c0, %c0_0] : memref<16x2xi32, #tpu.memory_space<vmem>>, vector<16x2xi32>
    %1 = vector.extract_strided_slice %0 {offsets = [0, 0], sizes = [16, 1], strides = [1, 1]} : vector<16x2xi32> to vector<16x1xi32>
    %2 = vector.extract_strided_slice %0 {offsets = [0, 1], sizes = [16, 1], strides = [1, 1]} : vector<16x2xi32> to vector<16x1xi32>
    %3 = tpu.iota {dimensions = array<i32: 1>} : vector<1x128xi32>
    %4 = vector.broadcast %1 : vector<16x1xi32> to vector<16x128xi32>
    %5 = vector.broadcast %3 : vector<1x128xi32> to vector<16x128xi32>
    %6 = arith.cmpi eq, %4, %5 : vector<16x128xi32>
    %7 = arith.extui %6 : vector<16x128xi1> to vector<16x128xi32>
    %8 = arith.sitofp %7 : vector<16x128xi32> to vector<16x128xf32>
    %9 = arith.truncf %8 : vector<16x128xf32> to vector<16x128xbf16>
    %c0_1 = arith.constant 0 : index
    %c0_2 = arith.constant 0 : index
    %10 = vector.load %arg3[%c0_1, %c0_2] : memref<128x32xbf16, #tpu.memory_space<vmem>>, vector<128x32xbf16>
    %cst = arith.constant dense<0.000000e+00> : vector<16x32xf32>
    %11 = tpu.matmul %9, %10, %cst {dimension_numbers = #tpu.dot_dimension_numbers<[1], [0], [0], [1], [0, 0, 1, 1], [], []>} : vector<16x128xbf16>, vector<128x32xbf16>, vector<16x32xf32> -> vector<16x32xf32>
    %c1_i32 = arith.constant 1 : i32
    %12 = arith.cmpi slt, %arg0, %c1_i32 : i32
    %13 = arith.extui %12 : i1 to i32
    %14 = arith.sitofp %13 : i32 to f32
    %c0_3 = arith.constant 0 : index
    %c0_4 = arith.constant 0 : index
    %15 = vector.load %arg2[%c0_3, %c0_4] : memref<16x32xbf16, #tpu.memory_space<vmem>>, vector<16x32xbf16>
    %16 = arith.extf %15 : vector<16x32xbf16> to vector<16x32xf32>
    %17 = vector.broadcast %14 : f32 to vector<16x32xf32>
    %18 = arith.mulf %16, %17 : vector<16x32xf32>
    %19 = arith.addf %11, %18 : vector<16x32xf32>
    %20 = arith.truncf %19 : vector<16x32xf32> to vector<16x32xbf16>
    %c0_5 = arith.constant 0 : index
    %c0_6 = arith.constant 0 : index
    %21 = vector.load %arg4[%c0_5, %c0_6] : memref<32x32xbf16, #tpu.memory_space<vmem>>, vector<32x32xbf16>
    %cst_7 = arith.constant dense<0.000000e+00> : vector<16x32xf32>
    %22 = tpu.matmul %20, %21, %cst_7 {dimension_numbers = #tpu.dot_dimension_numbers<[1], [0], [0], [1], [0, 0, 1, 1], [], []>} : vector<16x32xbf16>, vector<32x32xbf16>, vector<16x32xf32> -> vector<16x32xf32>
    %c0_8 = arith.constant 0 : index
    %c0_9 = arith.constant 0 : index
    %23 = vector.load %arg5[%c0_8, %c0_9] : memref<1x32xf32, #tpu.memory_space<vmem>>, vector<1x32xf32>
    %24 = vector.broadcast %23 : vector<1x32xf32> to vector<16x32xf32>
    %25 = arith.addf %22, %24 : vector<16x32xf32>
    %26 = math.tanh %25 : vector<16x32xf32>
    %27 = arith.truncf %26 : vector<16x32xf32> to vector<16x32xbf16>
    %c0_10 = arith.constant 0 : index
    %c0_11 = arith.constant 0 : index
    %28 = vector.load %arg6[%c0_10, %c0_11] : memref<32x128xbf16, #tpu.memory_space<vmem>>, vector<32x128xbf16>
    %cst_12 = arith.constant dense<0.000000e+00> : vector<16x128xf32>
    %29 = tpu.matmul %27, %28, %cst_12 {dimension_numbers = #tpu.dot_dimension_numbers<[1], [0], [0], [1], [0, 0, 1, 1], [], []>} : vector<16x32xbf16>, vector<32x128xbf16>, vector<16x128xf32> -> vector<16x128xf32>
    %30 = arith.truncf %29 : vector<16x128xf32> to vector<16x128xbf16>
    %c0_13 = arith.constant 0 : index
    %c0_14 = arith.constant 0 : index
    %31 = vector.load %arg8[%c0_13, %c0_14] : memref<16x128xbf16, #tpu.memory_space<vmem>>, vector<16x128xbf16>
    tpu.vector_store %arg8[%c0_13, %c0_14], %30 {strides = array<i32>} : memref<16x128xbf16, #tpu.memory_space<vmem>>, vector<16x128xbf16>,
    %c0_i32 = arith.constant 0 : i32
    %32 = vector.broadcast %c0_i32 : i32 to vector<16x1xi32>
    %33 = arith.cmpi sge, %2, %32 : vector<16x1xi32>
    %34 = arith.extui %33 : vector<16x1xi1> to vector<16x1xi32>
    %35 = arith.sitofp %34 : vector<16x1xi32> to vector<16x1xf32>
    %cst_15 = arith.constant dense<0xFF800000> : vector<16xf32>
    %36 = vector.multi_reduction <maximumf>, %29, %cst_15 [1] : vector<16x128xf32> to vector<16xf32>
    %37 = vector.shape_cast %36 : vector<16xf32> to vector<16x1xf32>
    %38 = vector.broadcast %37 : vector<16x1xf32> to vector<16x128xf32>
    %39 = arith.subf %29, %38 : vector<16x128xf32>
    %40 = math.exp %39 : vector<16x128xf32>
    %cst_16 = arith.constant dense<0.000000e+00> : vector<16xf32>
    %41 = vector.multi_reduction <add>, %40, %cst_16 [1] : vector<16x128xf32> to vector<16xf32>
    %42 = vector.shape_cast %41 : vector<16xf32> to vector<16x1xf32>
    %43 = math.log %42 : vector<16x1xf32>
    %44 = arith.addf %37, %43 : vector<16x1xf32>
    %45 = vector.broadcast %3 : vector<1x128xi32> to vector<16x128xi32>
    %46 = vector.broadcast %2 : vector<16x1xi32> to vector<16x128xi32>
    %47 = arith.cmpi eq, %45, %46 : vector<16x128xi32>
    %c0_i32_17 = arith.constant 0 : i32
    %48 = vector.broadcast %c0_i32_17 : i32 to vector<16x1xi32>
    %49 = arith.cmpi sge, %2, %48 : vector<16x1xi32>
    %50 = vector.broadcast %49 : vector<16x1xi1> to vector<16x128xi1>
    %51 = arith.andi %47, %50 : vector<16x128xi1>
    %cst_18 = arith.constant 0.000000e+00 : f32
    %52 = vector.broadcast %cst_18 : f32 to vector<16x128xf32>
    %53 = arith.select %51, %29, %52 : vector<16x128xi1>, vector<16x128xf32>
    %54 = vector.shape_cast %53 : vector<16x128xf32> to vector<1x16x128xf32>
    %cst_19 = arith.constant dense<0.000000e+00> : vector<1xf32>
    %55 = vector.multi_reduction <add>, %54, %cst_19 [1, 2] : vector<1x16x128xf32> to vector<1xf32>
    %56 = vector.shape_cast %55 : vector<1xf32> to vector<1x1x1xf32>
    %57 = vector.extract %56[0, 0, 0] : f32 from vector<1x1x1xf32>
    %58 = arith.mulf %44, %35 : vector<16x1xf32>
    %59 = vector.shape_cast %58 : vector<16x1xf32> to vector<1x16x1xf32>
    %cst_20 = arith.constant dense<0.000000e+00> : vector<1xf32>
    %60 = vector.multi_reduction <add>, %59, %cst_20 [1, 2] : vector<1x16x1xf32> to vector<1xf32>
    %61 = vector.shape_cast %60 : vector<1xf32> to vector<1x1x1xf32>
    %62 = vector.extract %61[0, 0, 0] : f32 from vector<1x1x1xf32>
    %63 = arith.subf %62, %57 : f32
    %64 = vector.shape_cast %35 : vector<16x1xf32> to vector<1x16x1xf32>
    %cst_21 = arith.constant dense<0.000000e+00> : vector<1xf32>
    %65 = vector.multi_reduction <add>, %64, %cst_21 [1, 2] : vector<1x16x1xf32> to vector<1xf32>
    %66 = vector.shape_cast %65 : vector<1xf32> to vector<1x1x1xf32>
    %67 = vector.extract %66[0, 0, 0] : f32 from vector<1x1x1xf32>
    %68 = tpu.iota {dimensions = array<i32: 1>} : vector<8x128xi32>
    %69 = vector.broadcast %63 : f32 to vector<1x1xf32>
    %70 = vector.shape_cast %69 : vector<1x1xf32> to vector<1x1xf32>
    %71 = vector.broadcast %70 : vector<1x1xf32> to vector<8x128xf32>
    %72 = vector.broadcast %67 : f32 to vector<1x1xf32>
    %73 = vector.shape_cast %72 : vector<1x1xf32> to vector<1x1xf32>
    %74 = vector.broadcast %73 : vector<1x1xf32> to vector<8x128xf32>
    %c0_i32_22 = arith.constant 0 : i32
    %75 = vector.broadcast %c0_i32_22 : i32 to vector<8x128xi32>
    %76 = arith.cmpi eq, %68, %75 : vector<8x128xi32>
    %c1_i32_23 = arith.constant 1 : i32
    %77 = vector.broadcast %c1_i32_23 : i32 to vector<8x128xi32>
    %78 = arith.cmpi eq, %68, %77 : vector<8x128xi32>
    %cst_24 = arith.constant 0.000000e+00 : f32
    %79 = vector.broadcast %cst_24 : f32 to vector<8x128xf32>
    %80 = arith.select %78, %74, %79 : vector<8x128xi1>, vector<8x128xf32>
    %81 = arith.select %76, %71, %80 : vector<8x128xi1>, vector<8x128xf32>
    %c0_25 = arith.constant 0 : index
    %c0_26 = arith.constant 0 : index
    %82 = vector.load %arg7[%c0_25, %c0_26] : memref<8x128xf32, #tpu.memory_space<vmem>>, vector<8x128xf32>
    tpu.vector_store %arg7[%c0_25, %c0_26], %81 {strides = array<i32>} : memref<8x128xf32, #tpu.memory_space<vmem>>, vector<8x128xf32>,
    return
  }
  func.func @transform_0(%arg0: i32) -> (i32, i32) {
    %c0_i32 = arith.constant 0 : i32
    %c0_i32_0 = arith.constant 0 : i32
    return %arg0, %c0_i32 : i32, i32
  }
  func.func @transform_1(%arg0: i32) -> (i32, i32) {
    %c0_i32 = arith.constant 0 : i32
    %0 = arith.minsi %arg0, %c0_i32 : i32
    %c0_i32_0 = arith.constant 0 : i32
    %c0_i32_1 = arith.constant 0 : i32
    return %0, %c0_i32_0 : i32, i32
  }
  func.func @transform_2(%arg0: i32) -> (i32, i32) {
    %c0_i32 = arith.constant 0 : i32
    %c0_i32_0 = arith.constant 0 : i32
    %c0_i32_1 = arith.constant 0 : i32
    return %c0_i32, %c0_i32_0 : i32, i32
  }
  func.func @transform_3(%arg0: i32) -> (i32, i32) {
    %c0_i32 = arith.constant 0 : i32
    %c0_i32_0 = arith.constant 0 : i32
    %c0_i32_1 = arith.constant 0 : i32
    return %c0_i32, %c0_i32_0 : i32, i32
  }
  func.func @transform_4(%arg0: i32) -> (i32, i32) {
    %c0_i32 = arith.constant 0 : i32
    %c0_i32_0 = arith.constant 0 : i32
    %c0_i32_1 = arith.constant 0 : i32
    return %c0_i32, %c0_i32_0 : i32, i32
  }
  func.func @transform_5(%arg0: i32) -> (i32, i32) {
    %c0_i32 = arith.constant 0 : i32
    %c0_i32_0 = arith.constant 0 : i32
    %c0_i32_1 = arith.constant 0 : i32
    return %c0_i32, %c0_i32_0 : i32, i32
  }
  func.func @transform_6(%arg0: i32) -> (i32, i32) {
    %c0_i32 = arith.constant 0 : i32
    %c0_i32_0 = arith.constant 0 : i32
    return %arg0, %c0_i32 : i32, i32
  }
  func.func @transform_7(%arg0: i32) -> (i32, i32) {
    %c0_i32 = arith.constant 0 : i32
    %c0_i32_0 = arith.constant 0 : i32
    return %arg0, %c0_i32 : i32, i32
  }
}

</mosaic_0001>

<bundles_post_ra>
// kernel: _fused_forward.1
= control target key start
LH: loop header
LB: loop body
LE: loop exit
PB: predicated region body
PF: predicated region fallthrough
CT: control target
= control target key end

     0   :  { %13 = vsyncpa [#allocation3], 0  ;;  %s1339_s0 = inlined_call_operand.vmem [shape: s32[32,2], index: 0, kind: input, shape index: {}]   ;;  %s1340_s1 = inlined_call_operand.vmem [shape: bf16[16,32], index: 1, kind: input, shape index: {}]   ;;  %s1341_s2 = inlined_call_operand.vmem [shape: bf16[128,32], index: 2, kind: input, shape index: {}]   ;;  %s1342_s3 = inlined_call_operand.vmem [shape: bf16[32,32], index: 3, kind: input, shape index: {}]   ;;  %s1343_s4 = inlined_call_operand.vmem [shape: f32[1,32], index: 4, kind: input, shape index: {}]   ;;  %s1344_s5 = inlined_call_operand.vmem [shape: bf16[32,128], index: 5, kind: input, shape index: {}]   ;;  %s1345_s6 = inlined_call_operand.vmem [shape: f32[16,128], index: 6, kind: output, shape index: {0}]   ;;  %s1346_s7 = inlined_call_operand.hbm [shape: bf16[32,128], index: 7, kind: output, shape index: {1}]  }
   0x1   :  { %15 = vsyncpa [#allocation3 + $0x1], 0  ;;  %s1125_s24 = smov 0   ;;  %s1127_s25 = smov 0  }
   0x2   :  { %s1129_s26 = smov 0   ;;  %s1131_s27 = smov 0  }
   0x3 LB: > { %s1146_s28 = sadd.s32 4294967295, %s1074_s27   ;;  %s828_s29 = sadd.s32 4294967294, %s1074_s27   ;;  %s1074_s27 = sphi %s1131_s27, %s1352_s27   ;;  %s1070_s26 = sphi %s1129_s26, %s1351_s26   ;;  %s1066_s25 = sphi %s1127_s25, %s1350_s25   ;;  %s1062_s24 = sphi %s1125_s24, %s1349_s24  }
   0x4   : > { %s1150_s30 = sadd.s32 1, %s1074_s27   ;;  %s194_s8 = sadd.s32 1, %s1070_s26 }
   0x5   : > { %s191_s9 = ssub.s32 %s1074_s27, %s1150_s30  ;;  %p204_p0 = scmp.ne.s32.totalorder %s1070_s26, %s1066_s25 }
   0x6   : > { %p192_p1 = scmp.eq.s32.totalorder %s191_s9, 0  ;;  %p205_p2 = scmp.eq.s32.totalorder %s1146_s28, 1 }
   0x7   : > { %p210_p3 = scmp.ne.s32.totalorder %s1066_s25, %s1062_s24  ;;  %p211_p4 = scmp.eq.s32.totalorder %s828_s29, 1 }
   0x8   : > { %s1161_s10 = scalar_select %p192_p1, %s1070_s26, %s194_s8  }
   0x9   : > { %p1163_p5 = por %p205_p2, %p204_p0  ;;  %p1167_p6 = por %p211_p4, %p210_p3 }
   0xa   : > { %p831_p7 = scmp.ge.s32.totalorder %s1074_s27, 1  ;;  %p263_p8 = scmp.lt.s32.totalorder %s1074_s27, 3 }
   0xc   : > { %p264_p9 = pnand %p831_p7, %p263_p8 }
   0xd   : > { %s833_s13 = sshll.u32 (!%p264_p9), %s1146_s28, 1  ;;  %p312_p11 = scmp.lt.s32.totalorder (!%p264_p9), %s1146_s28, 0 }
   0xe   : > { %267 = sbr.rel (%p264_p9) target bundleno = 1408 (0x580), region = 44  ;;  %p307_p10 = scmp.lt.s32.totalorder (!%p264_p9), %s833_s13, 3 }
   0xf   : > { %p322_p13 = scmp.lt.s32.totalorder (!%p264_p9), %s1146_s28, 1  ;;  %s868_s14 = sshll.u32 (!%p264_p9), %s1146_s28, 7 }
  0x13   : > { %v990_v0 = vld [vmem:[%s1341_s2 + $0x38] sm:$0xff]   ;;  %v1076_v1 = vmov 0   ;;  %v1077_v2 = vmov 0.0   ;;  %v991_v3 = vld [vmem:[%s1341_s2 + $0x30] sm:$0xff]   ;;  %s1354_s13 = smov (!%p307_p10, %s833_s13), 3  ;;  %v992_v4 = vld [vmem:[%s1341_s2 + $0x28] sm:$0xff]   ;;  %v330_v12 = vlaneseq }
  0x14   : > { %982 = vset.pattern.permute.xlu0 %v1076_v1  ;;  %893 = vmatprep.subr.bf16.mxu0 %v1077_v2  ;;  %s834_s18 = sshll.u32 %s1354_s13, 3  ;;  %vm1078_vm0 = vmmov 0   ;;  %v993_v7 = vld [vmem:[%s1341_s2 + $0x20] sm:$0xff]   ;;  %v994_v8 = vld [vmem:[%s1341_s2 + $0x18] sm:$0xff]   ;;  %v995_v9 = vld [vmem:[%s1341_s2 + $0x10] sm:$0xff]   ;;  %vm484_vm4 = vcmask 261120  }
  0x15   : > { %894 = vmatpush3.bf16.msra.mxu0 %v990_v0  ;;  %913 = vmatprep.subr.bf16.mxu1 %v1077_v2  ;;  %s310_s21 = scalar_lea.vmem %s1339_s0, %s834_s18  ;;  %v996_v10 = vld [vmem:[%s1341_s2 + $0x8] sm:$0xff]   ;;  %v997_v11 = vld [vmem:[%s1341_s2] sm:$0xff]   ;;  %v1221_v14 = vand.u32 127, %v330_v12  ;;  %v1079_v16 = vmov 1.0|1.0   ;;  %v1080_v49 = vmov 1   ;;  %s1285_s18 = scalar_lea.hbm %s1346_s7, %s868_s14 }
  0x16   : > { %895 = vmatprep.subr.bf16.mxu0 %v1077_v2  ;;  %v1190_v5 = vld [vmem:[%s310_s21] sm:$0xff]  ;;  %v1194_v6 = vld [vmem:[%s310_s21 + $0x8] sm:$0xff]  ;;  %909 = vmatprep.mubr.msk.bf16.mxu0 %vm1078_vm0, %v1077_v2  ;;  %s313_s29 = scalar_select %p312_p11, %s1146_s28, 0  ;;  %vm668_vm13 = vcmask 7168  }
  0x17   : > { %333 = vperm.xlu0 %982, %v1190_v5   ;;  %917 = vmatprep.mubr.msk.bf16.mxu1 %vm1078_vm0, %v1077_v2  ;;  %v998_v17 = vld [vmem:[%s1342_s3 + $0x8] sm:$0xff]   ;;  %v999_v18 = vld [vmem:[%s1342_s3] sm:$0xff]   ;;  %s362_s13 = scalar_select %p322_p13, 1, 0  ;;  %vm602_vm5 = vcmp.ge.s32.totalorder %v1190_v5, 0  ;;  %vm603_vm6 = vcmp.ge.s32.totalorder %v1194_v6, 0 }
  0x18   : > { %914 = vmatpush3.bf16.msra.mxu1 %v998_v17  ;;  %s835_s8 = sshll.u32 %s313_s29, 1  ;;  %v1000_v32 = vld [vmem:[%s1344_s5 + $0x8] sm:$0xff]   ;;  %v1001_v33 = vld [vmem:[%s1344_s5] sm:$0xff]   ;;  %s303_s29 = sand.u32 1, %s1066_s25   ;;  %983 = vset.pattern.permute.xlu1 %v1080_v49  ;;  %v604_v58 = vsel %vm602_vm5, 1, %v1076_v1  ;;  %v605_v59 = vsel %vm603_vm6, 1, %v1076_v1 }
  0x19   : > { %896 = vmatpush3.bf16.msra.mxu0 %v991_v3  ;;  %915 = vmatprep.subr.bf16.mxu1 %v1077_v2  ;;  %p315_p12 = scmp.lt.s32.totalorder %s835_s8, 1  ;;  %s363_s17 = scvt.s32.f32 %s362_s13  ;;  %v850_v34 = vld [vmem:[%s1343_s4] ss:$0 sm:$0xff]  ;;  %v859_v60 = vsel %vm602_vm5, 1.0, %v1077_v2  ;;  %v860_v61 = vsel %vm603_vm6, 1.0, %v1077_v2 }
  0x1a   : > { %897 = vmatprep.subr.bf16.mxu0 %v1077_v2  ;;  %v984_v62 = vpack.i.bf16 %v860_v61, %v859_v60  ;;  %s1081_s13 = smov 127   ;;  %s1291_s19 = scalar_lea.sflag [#allocation3], %s303_s29 }
  0x1b   : > { %336 = vperm.xlu0 %982, %v1194_v6   ;;  %s1356_s8 = smov (!%p315_p12, %s835_s8), 1  ;;  %v368_v22 = vstv %s363_s17  ;;  %s1082_s21 = smov [#allocation2]  }
  0x1c   : > { %916 = vmatpush3.bf16.msra.mxu1 %v999_v18  ;;  %s836_s9 = sshll.u32 %s1356_s8, 2  ;;  %s1261_s8 = sshll.u32 %s303_s29, 3 }
  0x1d   : > { %898 = vmatpush3.bf16.msra.mxu0 %v992_v4  ;;  %921 = vmatprep.subr.bf16.mxu1 %v1077_v2  ;;  %s318_s16 = scalar_lea.vmem %s1340_s1, %s836_s9  ;;  %s305_s9 = scalar_lea.vmem [#allocation2], %s1261_s8 }
  0x1e   : > { %899 = vmatprep.subr.bf16.mxu0 %v1077_v2  ;;  %v870_v19 = vld [vmem:[%s318_s16] sm:$0xff]   ;;  %s730_s15 = sshll.u32 %s305_s9, 4  ;;  %s1018_s22 = sshll.u32 %s1082_s21, 4  ;;  %s1287_s15 = int_to_ptr.vmem [resolvable:$true] %s730_s15  ;;  %s1019_s22 = int_to_ptr.vmem [resolvable:$false] %s1018_s22 }
  0x1f   : > { %v871_v20 = vunpack.c.l.bf16 %v870_v19  ;;  %v872_v21 = vunpack.c.h.bf16 %v870_v19  ;;  %989 = vset.pattern.permute.xlu0 %v1080_v49  ;;  %s1014_s20 = scalar_lea.vmem %s1287_s15, 128  ;;  %s1020_s23 = scalar_lea.vmem %s1019_s22, 256 }
  0x20   : > { %p1015_p0 = scmp.ne.s32.totalorder %s1287_s15, %s1014_s20  ;;  %p1021_p3 = scmp.lt.s32.totalorder %s1287_s15, %s1019_s22 }
  0x21   : > { %900 = vmatpush3.bf16.msra.mxu0 %v993_v7  ;;  %v369_v24 = vmul.f32 %v871_v20, %v368_v22  ;;  %v370_v25 = vmul.f32 %v872_v21, %v368_v22  ;;  %p1022_p4 = scmp.lt.s32.totalorder %s1020_s23, %s1014_s20 }
  0x22   : > { %901 = vmatprep.subr.bf16.mxu0 %v1077_v2  ;;  %p1016_p1 = pnand %p1015_p0, %p1163_p5 }
  0x23   : > { %p1023_p7 = por %p1022_p4, %p1021_p3 }
  0x24   : > { %p1017_p2 = pneg %p1016_p1 }
  0x25   : > { %902 = vmatpush3.bf16.msra.mxu0 %v994_v8 }
  0x26   : > { %903 = vmatprep.subr.bf16.mxu0 %v1077_v2  ;;  %p1024_p8 = pnand %p1023_p7, %p1017_p2 }
  0x29   : > { %904 = vmatpush3.bf16.msra.mxu0 %v995_v9 }
  0x2a   : > { %905 = vmatprep.subr.bf16.mxu0 %v1077_v2 }
  0x2d   : > { %906 = vmatpush3.bf16.msra.mxu0 %v996_v10 }
  0x2e   : > { %907 = vmatprep.subr.bf16.mxu0 %v1077_v2 }
  0x31   : > { %908 = vmatpush3.bf16.msra.mxu0 %v997_v11 }
  0x92   : > { %v334_v13 = vpop.permute.xlu0 %333 }
  0x93   : > { %vm338_vm1 = vcmp.eq.s32.totalorder %v334_v13, %v1221_v14 }
  0x96   : > { %v337_v15 = vpop.permute.xlu0 %336 }
  0x97   : > { %vm339_vm2 = vcmp.eq.s32.totalorder %v337_v15, %v1221_v14 }
  0x98   : > { %vm848_vm3 = vmpackc.low %vm339_vm2, %vm338_vm1 }
  0x99   : > { %910 = vmatmul.mubr.msk.bf16.vlgmr.msra.gmra.mxu0 %vm848_vm3, %v1079_v16 }
 0x159   : > { %v453_v23 = vpop.f32.mrf.mxu0 }
 0x15a   : > { %v454_v28 = vadd.f32 %v453_v23, %v369_v24 }
 0x15b   : > { %v911_v26 = vpop.f32.mrf.mxu0 }
 0x15d   : > { %v456_v27 = vpop.f32.mrf.mxu0 }
 0x15e   : > { %v457_v29 = vadd.f32 %v456_v27, %v370_v25 }
 0x15f   : > { %v912_v30 = vpop.f32.mrf.mxu0 }
 0x160   : > { %v460_v31 = vpack.c.bf16 %v457_v29, %v454_v28 }
 0x162   : > { %918 = vmatmul.mubr.msk.bf16.vlgmr.msra.gmra.mxu1 %vm484_vm4, %v460_v31 }
 0x163   : > { %925 = vmatprep.mubr.msk.bf16.mxu1 %vm1078_vm0, %v1077_v2  ;;  %922 = vmatpush3.bf16.msra.mxu1 %v1000_v32 }
 0x164   : > { %923 = vmatprep.subr.bf16.mxu1 %v1077_v2 }
 0x167   : > { %924 = vmatpush3.bf16.msra.mxu1 %v1001_v33 }
 0x222   : > { %v522_v35 = vpop.f32.mrf.mxu1 }
 0x223   : > { %v523_v36 = vadd.f32 %v850_v34, %v522_v35 }
 0x224   : > { %v919_v37 = vpop.f32.mrf.mxu1 }
 0x225   : > { %1002 = vtanh.f32 %v523_v36 }
 0x226   : > { %v525_v38 = vpop.f32.mrf.mxu1 }
 0x227   : > { %v526_v39 = vadd.f32 %v850_v34, %v525_v38 }
 0x228   : > { %v920_v40 = vpop.f32.mrf.mxu1 }
 0x229   : > { %1004 = vtanh.f32 %v526_v39 }
 0x232   : > { %v1003_v41 = vpop.eup %1002 }
 0x236   : > { %v1005_v42 = vpop.eup %1004 }
 0x237   : > { %v531_v43 = vpack.c.bf16 %v1005_v42, %v1003_v41 }
 0x239   : > { %926 = vmatmul.mubr.msk.bf16.vlgmr.msra.gmra.mxu1 %vm484_vm4, %v531_v43 }
 0x2f9   : > { %v1256_v44 = vpop.f32.mrf.mxu1 }
 0x2fa   : > { %608 = vmax.xlane.f32.xlu1 %v1256_v44 }
 0x2fb   : > { %v927_v45 = vpop.f32.mrf.mxu1 }
 0x2fd   : > { %v588_v46 = vpop.f32.mrf.mxu1 }
 0x2fe   : > { %v876_v47 = vpack.c.bf16 %v588_v46, %v1256_v44  ;;  %610 = vmax.xlane.f32.xlu1 %v588_v46 }
 0x2ff   : > { %v928_v48 = vpop.f32.mrf.mxu1 }
 0x300   : > { %877 = vst [vmem:[%s305_s9] sm:$0xff] %v876_v47  }
 0x383   : > { %v609_v50 = vpop.xlane.xlu1 %608 }
 0x384   : > { %v612_v51 = vsub.f32 %v1256_v44, %v609_v50 }
 0x386   : > { %v614_v52 = vmul.f32 1.442695, %v612_v51 }
 0x387   : > { %v611_v53 = vpop.xlane.xlu1 %610 }
 0x388   : > { %1006 = vpow2.f32 %v614_v52  ;;  %v613_v54 = vsub.f32 %v588_v46, %v611_v53 }
 0x38a   : > { %v616_v55 = vmul.f32 1.442695, %v613_v54 }
 0x38c   : > { %1008 = vpow2.f32 %v616_v55 }
 0x395   : > { %v1007_v56 = vpop.eup %1006 }
 0x396   : > { %618 = vadd.xlane.f32.xlu0 %v1007_v56 }
 0x399   : > { %v1009_v57 = vpop.eup %1008 }
 0x39a   : > { %620 = vadd.xlane.f32.xlu1 %v1009_v57 }
 0x3ab   : > { %629 = vperm.xlu1 %983, %v1190_v5  }
 0x3af   : > { %632 = vperm.xlu1 %983, %v1194_v6  }
 0x3b3   : > { %637 = vperm.xlu1 %983, %v604_v58  }
 0x3b7   : > { %640 = vperm.xlu1 %983, %v605_v59  }
 0x41f   : > { %v619_v63 = vpop.xlane.xlu0 %618 }
 0x420   : > { %1010 = vlog2.f32 %v619_v63 }
 0x423   : > { %v621_v0 = vpop.xlane.xlu1 %620 }
 0x424   : > { %1012 = vlog2.f32 %v621_v0 }
 0x427   : > { %v630_v10 = vpop.permute.xlu1 %629 }
 0x428   : > { %vm634_vm9 = vcmp.eq.s32.totalorder %v1221_v14, %v630_v10 }
 0x42b   : > { %v633_v2 = vpop.permute.xlu1 %632 }
 0x42c   : > { %vm635_vm7 = vcmp.eq.s32.totalorder %v1221_v14, %v633_v2 }
 0x42d   : > { %v1011_v3 = vpop.eup %1010 }
 0x42e   : > { %v623_v4 = vmul.f32 0.6931472, %v1011_v3 }
 0x42f   : > { %v638_v11 = vpop.permute.xlu1 %637 }
 0x430   : > { %v626_v5 = vadd.f32 %v623_v4, %v609_v50  ;;  %vm642_vm10 = vcmp.eq.s32.totalorder %v638_v11, 1 }
 0x431   : > { %v1013_v7 = vpop.eup %1012  ;;  %vm644_vm12 = vmand %vm634_vm9, %vm642_vm10 }
 0x432   : > { %v625_v8 = vmul.f32 0.6931472, %v1013_v7  ;;  %v658_v9 = vmul.f32 %v859_v60, %v626_v5  ;;  %v646_v15 = vsel %vm644_vm12, %v1256_v44, 0.0 }
 0x433   : > { %v641_v12 = vpop.permute.xlu1 %640 }
 0x434   : > { %662 = vrot.lane.b32.xlu0 %v658_v9, %s1081_s13  ;;  %v627_v6 = vadd.f32 %v625_v8, %v611_v53  ;;  %vm643_vm8 = vcmp.eq.s32.totalorder %v641_v12, 1 }
 0x435   : > { %vm645_vm11 = vmand %vm635_vm7, %vm643_vm8 }
 0x436   : > { %v659_v1 = vmul.f32 %v860_v61, %v627_v6  ;;  %v647_v13 = vsel %vm645_vm11, %v588_v46, 0.0 }
 0x437   : > { %v648_v16 = vadd.f32 %v647_v13, %v646_v15 }
 0x438   : > { %664 = vrot.lane.b32.xlu1 %v659_v1, %s1081_s13 }
 0x43c   : > { %985 = vrot.lane.b32.xlu1 %v984_v62, %s1081_s13 }
 0x460   : > { %649 = vadd.xlane.f32.xlu1 %v648_v16 }
 0x4a6   : > { %v663_v17 = vpop.permute.xlu0 %662 }
 0x4a7   : > { %v669_v19 = vsel %vm668_vm13, %v663_v17, 0.0 }
 0x4aa   : > { %v665_v18 = vpop.permute.xlu1 %664 }
 0x4ab   : > { %v670_v20 = vsel %vm668_vm13, %v665_v18, 0.0 }
 0x4ac   : > { %v671_v21 = vadd.f32 %v670_v20, %v669_v19 }
 0x4ae   : > { %672 = vadd.xlane.f32.xlu0 %v671_v21  ;;  %v986_v22 = vpop.permute.xlu1 %985 }
 0x4af   : > { %v988_v23 = vunpack.i.h.bf16 %v986_v22  ;;  %v987_v24 = vunpack.i.l.bf16 %v986_v22 }
 0x4b1   : > { %v690_v25 = vsel %vm668_vm13, %v987_v24, 0.0  ;;  %v691_v26 = vsel %vm668_vm13, %v988_v23, 0.0 }
 0x4b2   : > { %v692_v27 = vadd.f32 %v691_v26, %v690_v25 }
 0x4b4   : > { %693 = vadd.xlane.f32.xlu1 %v692_v27 }
 0x4e9   : > { %v650_v28 = vpop.xlane.xlu1 %649 }
 0x4ea   : > { %v651_v29 = vrot.slane %v650_v28, 4 }
 0x4ec   : > { %v652_v30 = vadd.f32 %v651_v29, %v650_v28 }
 0x4ee   : > { %v653_v31 = vrot.slane %v652_v30, 2 }
 0x4f0   : > { %v654_v32 = vadd.f32 %v653_v31, %v652_v30 }
 0x4f2   : > { %v655_v33 = vrot.slane %v654_v32, 1 }
 0x4f4   : > { %v656_v34 = vadd.f32 %v655_v33, %v654_v32 }
 0x4f6   : > { %929 = vpush %v656_v34 }
 0x4f7   : > { %1027 = shalt.err (!%p1024_p8)
}
 0x4f8   : > { %s1028_s29 = scalar_lea.hbm %s1285_s18, 128  ;;  %s1032_s13 = scalar_lea.hbm %s1346_s7, 256 }
 0x4f9   : > { %p1029_p9 = scmp.ne.s32.totalorder %s1285_s18, %s1028_s29  ;;  %p1033_p12 = scmp.lt.s32.totalorder %s1285_s18, %s1346_s7 }
 0x4fa   : > { %p1034_p0 = scmp.lt.s32.totalorder %s1032_s13, %s1028_s29 }
 0x4fb   : > { %p1030_p10 = pnand %p1029_p9, %p1163_p5 }
 0x4fc   : > { %p1035_p1 = por %p1034_p0, %p1033_p12 }
 0x4fd   : > { %p1031_p11 = pneg %p1030_p10 }
 0x4ff   : > { %p1036_p2 = pnand %p1035_p1, %p1031_p11 }
 0x501   : > { %1039 = shalt.err (!%p1036_p2)
}
 0x502   : > { %s1083_s17 = smov 64   ;;  %s1084_s20 = smov 4   ;;  %vm705_vm14 = vcmp.eq.s32.totalorder %v1221_v14, 1  ;;  %vm704_vm15 = vcmp.eq.s32.totalorder %v1221_v14, 0 }
 0x503   : > { %935 = dma.vmem_to_hbm [thread:$0]  (%p1163_p5), %s1287_s15, 128, %s1285_s18, %s1291_s19, %s1083_s17, %s1083_s17, %s1084_s20  }
 0x504   : > { %s1358_s28 = smov (!%p322_p13, %s1146_s28), 1 }
 0x505   : > { %s837_s19 = sshll.u32 %s1358_s28, 3 }
 0x506   : > { %s325_s29 = scalar_lea.vmem %s1345_s6, %s837_s19 }
 0x527   : > { %s930_s11 = spop %929 }
 0x537   : > { %v673_v35 = vpop.xlane.xlu0 %672 }
 0x538   : > { %v674_v36 = vrot.slane %v673_v35, 4 }
 0x53a   : > { %v675_v37 = vadd.f32 %v674_v36, %v673_v35 }
 0x53c   : > { %v676_v38 = vrot.slane %v675_v37, 2 }
 0x53d   : > { %v694_v39 = vpop.xlane.xlu1 %693 }
 0x53e   : > { %v677_v40 = vadd.f32 %v676_v38, %v675_v37  ;;  %v695_v41 = vrot.slane %v694_v39, 4 }
 0x540   : > { %v696_v42 = vadd.f32 %v695_v41, %v694_v39  ;;  %v678_v43 = vrot.slane %v677_v40, 1 }
 0x542   : > { %v697_v44 = vrot.slane %v696_v42, 2  ;;  %v679_v45 = vadd.f32 %v678_v43, %v677_v40 }
 0x544   : > { %v698_v46 = vadd.f32 %v697_v44, %v696_v42  ;;  %931 = vpush %v679_v45 }
 0x546   : > { %v699_v47 = vrot.slane %v698_v46, 1 }
 0x548   : > { %v700_v48 = vadd.f32 %v699_v47, %v698_v46 }
 0x54a   : > { %933 = vpush %v700_v48 }
 0x575   : > { %s932_s15 = spop %931 }
 0x576   : > { %s681_s18 = ssub.f32 %s932_s15, %s930_s11 }
 0x578   : > { %v702_v50 = vstv %s681_s18 }
 0x57b   : > { %s934_s21 = spop %933 }
 0x57c   : > { %v703_v49 = vstv %s934_s21 }
 0x57d   : > { %v706_v51 = vsel %vm705_vm14, %v703_v49, 0.0 }
 0x57e   : > { %v707_v52 = vsel %vm704_vm15, %v702_v50, %v706_v51 }
 0x57f   : > { %708 = vst [vmem:[%s325_s29] sm:$0xff] %v707_v52 }
 0x580 PF: > { %p941_p5 = scmp.ge.s32.totalorder %s1074_s27, 2  ;;  %s752_s28 = sand.u32 1, %s1062_s24  }
 0x581   : > { %s753_s8 = scalar_lea.sflag [#allocation3], %s752_s28 }
 0x582   : > { %p938_p13 = pnand %p941_p5, %p1167_p6 }
 0x584   : > { %p939_p3 = pneg %p938_p13 }
 0x586   : > { %1057 = dma.done.wait (%p939_p3), %s753_s8, 128  }
 0x587   : > { %1059 = vsyncadd (%p939_p3), %s753_s8, 4294967168  ;;  %p18_p4 = scmp.ge.s32.totalorder %s1150_s30, 4   ;;  %s1349_s24 = smov %s1066_s25 }
 0x588   : > { %s1350_s25 = smov %s1070_s26  ;;  %s1351_s26 = smov %s1161_s10 }
 0x589   : > { %s1352_s27 = smov %s1150_s30  ;;  %20 = sbr.rel (!%p18_p4) target bundleno = 3 (0x3), region = 94 }
 0x58e   :  { %758 = vsyncpa [#allocation3], 1 }
 0x58f   :  { %760 = vsyncpa [#allocation3 + $0x1], 1 }

</bundles_post_ra>
